<compile_context>
chip_gen: v5e
topology: v5e:2x2
jax: 0.10.0
libtpu: 0.0.40
codegen_flags: <defaults>
</compile_context>

<pallas_src>
import math

import jax
import jax.numpy as jnp
from jax import lax
from jax.experimental import pallas as pl
from jax.experimental.pallas import tpu as pltpu

# ---------------- config (small Llama-like) ----------------
B = 2              # batch
S = 8              # seq len
H = 32             # hidden_size
NH = 4             # num_attention_heads
NKV = 2            # num_key_value_heads
HD = H // NH       # head_dim = 8
GROUPS = NH // NKV # 2
DQ = NH * HD       # 32
DKV = NKV * HD     # 16
DQKV = DQ + 2 * DKV  # 64
I = 64             # intermediate_size
EPS = 1e-6
ROPE_THETA = 10000.0
BS = B * S
NEG = -1e30


def decoder_kernel(x_ref, wqkv2_ref, wow_ref, wgu_ref, wdn_ref,
                   g1_ref, g2_ref, cos_ref, sin_ref, bias_ref, out_ref):
    f32 = jnp.float32
    bf16 = jnp.bfloat16

    x = x_ref[...]                                            # [BS, H] f32 (residual)

    # ---- input RMSNorm (f32 elementwise) ----
    h = x * lax.rsqrt(jnp.mean(x * x, axis=-1, keepdims=True) + EPS) * g1_ref[...]

    # ---- fused QKV + rotate-half projection: [16,32]@[32,128] (bf16 MXU, f32 acc) ----
    big = jnp.dot(h.astype(bf16), wqkv2_ref[...], preferred_element_type=f32)  # [BS, 2*DQKV]

    # ---- RoPE as two VPU multiplies (V columns use cos=1 / rotated part == 0) ----
    qkv = big[:, :DQKV] * cos_ref[...] + big[:, DQKV:] * sin_ref[...]          # [BS, DQKV] f32
    qkv_b = qkv.astype(bf16)

    # ---- V @ Wo for ALL heads in one lane-dense matmul: [16,16]@[16,128] ----
    v_all = qkv_b[:, DQ + DKV:]                                                # [BS, DKV]
    vwo = jnp.dot(v_all, wow_ref[...], preferred_element_type=f32)             # [BS, NH*H]
    vwo_b = vwo.astype(bf16)

    bias2 = bias_ref[...]                                                      # [GROUPS*BS, BS]

    # ---- causal GQA SDPA, query heads of each KV group stacked along sublanes ----
    o = jnp.zeros((BS, H), f32)
    for kvh in range(NKV):
        k_h = qkv_b[:, DQ + kvh * HD: DQ + (kvh + 1) * HD]                     # [BS, HD]
        h0 = kvh * GROUPS
        q_st = jnp.concatenate(
            [qkv_b[:, (h0 + g) * HD: (h0 + g + 1) * HD] for g in range(GROUPS)],
            axis=0)                                                            # [GROUPS*BS, HD]
        s = lax.dot_general(q_st, k_h, (((1,), (1,)), ((), ())),
                            preferred_element_type=f32) + bias2                # [GROUPS*BS, BS]
        p = jnp.exp(s - jnp.max(s, axis=-1, keepdims=True))
        p = p * pl.reciprocal(jnp.sum(p, axis=-1, keepdims=True), approx=True)
        p_b = p.astype(bf16)
        for g in range(GROUPS):
            hh = h0 + g
            o = o + jnp.dot(p_b[g * BS:(g + 1) * BS],
                            vwo_b[:, hh * H:(hh + 1) * H],
                            preferred_element_type=f32)                        # [BS, H]

    h1 = x + o                                                # residual add (f32)

    # ---- post-attention RMSNorm ----
    h2 = h1 * lax.rsqrt(jnp.mean(h1 * h1, axis=-1, keepdims=True) + EPS) * g2_ref[...]

    # ---- MLP: SiLU(gate) * up, then down proj + residual ----
    gu = jnp.dot(h2.astype(bf16), wgu_ref[...], preferred_element_type=f32)    # [BS, 2*I]
    gate = gu[:, :I]
    up = gu[:, I:]
    inter = gate * jax.nn.sigmoid(gate) * up                  # SiLU in f32
    down = jnp.dot(inter.astype(bf16), wdn_ref[...], preferred_element_type=f32)  # [BS, H]

    out_ref[...] = h1 + down


@jax.jit
def llama_decoder_layer(x, wqkv2, wo_wide, wgu_b, wdn_b, g1, g2, cos_qkv, sin_qkv, bias2):
    """All constant tables / bf16 weights are prepared once by build_tables()."""
    x2 = x.reshape(BS, H)

    out2 = pl.pallas_call(
        decoder_kernel,
        out_shape=jax.ShapeDtypeStruct((BS, H), jnp.float32),
        grid_spec=pltpu.PrefetchScalarGridSpec(
            num_scalar_prefetch=0,
            grid=(1,),                                            # batch folded: single step
            in_specs=[
                pl.BlockSpec((BS, H), lambda i: (0, 0)),          # hidden states [B*S, H]
                pl.BlockSpec((H, 2 * DQKV), lambda i: (0, 0)),    # [Wqkv | Wqkv@R] (bf16)
                pl.BlockSpec((DKV, NH * H), lambda i: (0, 0)),    # block-structured Wo (bf16)
                pl.BlockSpec((H, 2 * I), lambda i: (0, 0)),       # gate_up weight (bf16)
                pl.BlockSpec((I, H), lambda i: (0, 0)),           # down_proj weight (bf16)
                pl.BlockSpec((1, H), lambda i: (0, 0)),           # input_layernorm weight
                pl.BlockSpec((1, H), lambda i: (0, 0)),           # post_attn_layernorm weight
                pl.BlockSpec((BS, DQKV), lambda i: (0, 0)),       # tiled rope cos
                pl.BlockSpec((BS, DQKV), lambda i: (0, 0)),       # tiled rope sin
                pl.BlockSpec((GROUPS * BS, BS), lambda i: (0, 0)),  # stacked causal bias
            ],
            out_specs=pl.BlockSpec((BS, H), lambda i: (0, 0)),
        ),
        compiler_params=pltpu.CompilerParams(dimension_semantics=("arbitrary",)),
    )(x2, wqkv2, wo_wide, wgu_b, wdn_b, g1, g2, cos_qkv, sin_qkv, bias2)

    return out2.reshape(B, S, H)


def build_tables(wqkv_t, wo_t, wgu_t, wdn_t, cos, sin):
    """One-time host-side prep: fold scale + rotate-half into Wqkv, block-structure Wo,
    tile cos/sin, build the block-diagonal causal bias, cast weights to bf16."""
    bf16 = jnp.bfloat16
    scale = 1.0 / math.sqrt(HD)

    # 1/sqrt(HD) folded into the q columns of the QKV weight.
    colscale = jnp.concatenate([jnp.full((DQ,), scale, jnp.float32),
                                jnp.ones((2 * DKV,), jnp.float32)])
    wqkv_s = wqkv_t * colscale[None, :]

    # Block-diagonal rotate_half matrix (identity-free on V columns -> zeros there).
    half = HD // 2
    eye = jnp.eye(half, dtype=jnp.float32)
    zero = jnp.zeros((half, half), jnp.float32)
    r_head = jnp.concatenate(
        [jnp.concatenate([zero, eye], axis=1),
         jnp.concatenate([-eye, zero], axis=1)], axis=0)            # [HD, HD]
    r_rope = jnp.kron(jnp.eye(NH + NKV, dtype=jnp.float32), r_head)  # q + k head slots
    r_full = jnp.zeros((DQKV, DQKV), jnp.float32).at[:DQ + DKV, :DQ + DKV].set(r_rope)

    # Fused RHS: [Wqkv | Wqkv @ R]  -> one [H, 2*DQKV] lane-dense matmul in the kernel.
    wqkv2 = jnp.concatenate([wqkv_s, wqkv_s @ r_full], axis=1).astype(bf16)   # [32, 128]

    # Block-structured Wo: rows = V lanes of kv head, cols = per-query-head H blocks.
    wo_wide = jnp.zeros((DKV, NH * H), jnp.float32)
    for hh in range(NH):
        kvh = hh // GROUPS
        wo_wide = wo_wide.at[kvh * HD:(kvh + 1) * HD, hh * H:(hh + 1) * H].set(
            wo_t[hh * HD:(hh + 1) * HD, :])
    wo_wide = wo_wide.astype(bf16)                                            # [16, 128]

    # cos/sin tiled across (batch rows, head slots); V columns get cos=1, sin=0.
    cos_qkv = jnp.concatenate(
        [jnp.tile(cos, (B, NH)), jnp.tile(cos, (B, NKV)),
         jnp.ones((BS, DKV), jnp.float32)], axis=-1)                          # [BS, DQKV]
    sin_qkv = jnp.concatenate(
        [jnp.tile(sin, (B, NH)), jnp.tile(sin, (B, NKV)),
         jnp.zeros((BS, DKV), jnp.float32)], axis=-1)                         # [BS, DQKV]

    # Block-diagonal (per folded batch) causal additive bias, tiled for stacked query heads.
    rows = jnp.arange(BS)
    ok = (rows[:, None] // S == rows[None, :] // S) & ((rows[:, None] % S) >= (rows[None, :] % S))
    bias = jnp.where(ok, 0.0, NEG).astype(jnp.float32)                        # [BS, BS]
    bias2 = jnp.tile(bias, (GROUPS, 1))                                       # [GROUPS*BS, BS]

    return wqkv2, wo_wide, wgu_t.astype(bf16), wdn_t.astype(bf16), cos_qkv, sin_qkv, bias2


def reference(x, wqkv_t, wo_t, wgu_t, wdn_t, g1, g2, cos, sin):
    """Plain-JAX f32 reference mirroring the PyTorch module semantics."""
    def rmsnorm(v, g):
        return v * lax.rsqrt(jnp.mean(v * v, axis=-1, keepdims=True) + EPS) * g

    def rope(t):  # [..., S, HD]
        t1, t2 = t[..., : HD // 2], t[..., HD // 2:]
        return t * cos + jnp.concatenate([-t2, t1], axis=-1) * sin

    h = rmsnorm(x, g1[0])
    qkv = h @ wqkv_t
    q = qkv[..., :DQ].reshape(B, S, NH, HD).transpose(0, 2, 1, 3)
    k = qkv[..., DQ:DQ + DKV].reshape(B, S, NKV, HD).transpose(0, 2, 1, 3)
    v = qkv[..., DQ + DKV:].reshape(B, S, NKV, HD).transpose(0, 2, 1, 3)
    q, k = rope(q), rope(k)
    k = jnp.repeat(k, GROUPS, axis=1)
    v = jnp.repeat(v, GROUPS, axis=1)
    s = jnp.einsum("bhqd,bhkd->bhqk", q, k) / math.sqrt(HD)
    mask = jnp.tril(jnp.ones((S, S), bool))
    s = jnp.where(mask, s, -1e30)
    p = jax.nn.softmax(s, axis=-1)
    a = jnp.einsum("bhqk,bhkd->bhqd", p, v).transpose(0, 2, 1, 3).reshape(B, S, DQ)
    h1 = x + a @ wo_t
    h2 = rmsnorm(h1, g2[0])
    gu = h2 @ wgu_t
    gate, up = gu[..., :I], gu[..., I:]
    return h1 + (jax.nn.silu(gate) * up) @ wdn_t


if __name__ == "__main__":
    key = jax.random.PRNGKey(0)
    ks = jax.random.split(key, 8)

    x = jax.random.normal(ks[0], (B, S, H), jnp.float32)
    # deterministic synthetic weights, stored pre-transposed as [in, out]
    wqkv_t = 0.05 * jax.random.normal(ks[1], (H, DQKV), jnp.float32)
    wo_t = 0.05 * jax.random.normal(ks[2], (DQ, H), jnp.float32)
    wgu_t = 0.05 * jax.random.normal(ks[3], (H, 2 * I), jnp.float32)
    wdn_t = 0.05 * jax.random.normal(ks[4], (I, H), jnp.float32)
    g1 = 1.0 + 0.1 * jax.random.normal(ks[5], (1, H), jnp.float32)
    g2 = 1.0 + 0.1 * jax.random.normal(ks[6], (1, H), jnp.float32)

    # RoPE tables for positions 0..S-1 (position_ids = arange(S))
    inv_freq = 1.0 / (ROPE_THETA ** (jnp.arange(0, HD, 2, dtype=jnp.float32) / HD))
    pos = jnp.arange(S, dtype=jnp.float32)
    freqs = pos[:, None] * inv_freq[None, :]              # [S, HD//2]
    emb = jnp.concatenate([freqs, freqs], axis=-1)        # [S, HD]
    cos = jnp.cos(emb)
    sin = jnp.sin(emb)

    # One-time setup (weight folding, bf16 casts, constant tables) — outside the per-call path.
    wqkv2, wo_wide, wgu_b, wdn_b, cos_qkv, sin_qkv, bias2 = build_tables(
        wqkv_t, wo_t, wgu_t, wdn_t, cos, sin)

    out = llama_decoder_layer(x, wqkv2, wo_wide, wgu_b, wdn_b, g1, g2,
                              cos_qkv, sin_qkv, bias2)
    out = jax.block_until_ready(out)

    ref = reference(x, wqkv_t, wo_t, wgu_t, wdn_t, g1, g2, cos, sin)
    assert out.shape == (B, S, H)
    # bf16 MXU inputs + EUP approx reciprocal in softmax -> compare at standard bf16 tolerance
    # against the f32 reference.
    assert jnp.allclose(out, ref, rtol=1e-2, atol=1e-2), "Pallas output mismatch vs JAX reference"

    print("KERNEL_OK")
</pallas_src>

<mosaic_0001>
module attributes {stable_mosaic.version = 11 : i64} {
  func.func @decoder_kernel(%arg0: i32, %arg1: memref<16x32xf32, #tpu.memory_space<vmem>>, %arg2: memref<32x128xbf16, #tpu.memory_space<vmem>>, %arg3: memref<16x128xbf16, #tpu.memory_space<vmem>>, %arg4: memref<32x128xbf16, #tpu.memory_space<vmem>>, %arg5: memref<64x32xbf16, #tpu.memory_space<vmem>>, %arg6: memref<1x32xf32, #tpu.memory_space<vmem>>, %arg7: memref<1x32xf32, #tpu.memory_space<vmem>>, %arg8: memref<16x64xf32, #tpu.memory_space<vmem>>, %arg9: memref<16x64xf32, #tpu.memory_space<vmem>>, %arg10: memref<32x16xf32, #tpu.memory_space<vmem>>, %arg11: memref<16x32xf32, #tpu.memory_space<vmem>>) attributes {dimension_semantics = [#tpu.dimension_semantics<arbitrary>], iteration_bounds = array<i64: 1>, scalar_prefetch = 0 : i64, scratch_operands = 0 : i64, tpu.core_type = #tpu.core_type<tc>, window_params = [{pipeline_mode = #tpu.pipeline_mode<synchronous>, transform_indices = @transform_0, window_bounds = array<i64: 16, 32>}, {pipeline_mode = #tpu.pipeline_mode<synchronous>, transform_indices = @transform_1, window_bounds = array<i64: 32, 128>}, {pipeline_mode = #tpu.pipeline_mode<synchronous>, transform_indices = @transform_2, window_bounds = array<i64: 16, 128>}, {pipeline_mode = #tpu.pipeline_mode<synchronous>, transform_indices = @transform_3, window_bounds = array<i64: 32, 128>}, {pipeline_mode = #tpu.pipeline_mode<synchronous>, transform_indices = @transform_4, window_bounds = array<i64: 64, 32>}, {pipeline_mode = #tpu.pipeline_mode<synchronous>, transform_indices = @transform_5, window_bounds = array<i64: 1, 32>}, {pipeline_mode = #tpu.pipeline_mode<synchronous>, transform_indices = @transform_6, window_bounds = array<i64: 1, 32>}, {pipeline_mode = #tpu.pipeline_mode<synchronous>, transform_indices = @transform_7, window_bounds = array<i64: 16, 64>}, {pipeline_mode = #tpu.pipeline_mode<synchronous>, transform_indices = @transform_8, window_bounds = array<i64: 16, 64>}, {pipeline_mode = #tpu.pipeline_mode<synchronous>, transform_indices = @transform_9, window_bounds = array<i64: 32, 16>}, {pipeline_mode = #tpu.pipeline_mode<synchronous>, transform_indices = @transform_10, window_bounds = array<i64: 16, 32>}]} {
    %c0 = arith.constant 0 : index
    %c0_0 = arith.constant 0 : index
    %0 = vector.load %arg1[%c0, %c0_0] : memref<16x32xf32, #tpu.memory_space<vmem>>, vector<16x32xf32>
    %1 = arith.mulf %0, %0 : vector<16x32xf32>
    %cst = arith.constant dense<0.000000e+00> : vector<16xf32>
    %2 = vector.multi_reduction <add>, %1, %cst [1] : vector<16x32xf32> to vector<16xf32>
    %3 = vector.shape_cast %2 : vector<16xf32> to vector<16x1xf32>
    %cst_1 = arith.constant 3.200000e+01 : f32
    %4 = vector.broadcast %cst_1 : f32 to vector<16x1xf32>
    %5 = arith.divf %3, %4 : vector<16x1xf32>
    %cst_2 = arith.constant 9.99999997E-7 : f32
    %6 = vector.broadcast %cst_2 : f32 to vector<16x1xf32>
    %7 = arith.addf %5, %6 : vector<16x1xf32>
    %8 = math.rsqrt %7 : vector<16x1xf32>
    %9 = vector.broadcast %8 : vector<16x1xf32> to vector<16x32xf32>
    %10 = arith.mulf %0, %9 : vector<16x32xf32>
    %c0_3 = arith.constant 0 : index
    %c0_4 = arith.constant 0 : index
    %11 = vector.load %arg6[%c0_3, %c0_4] : memref<1x32xf32, #tpu.memory_space<vmem>>, vector<1x32xf32>
    %12 = vector.broadcast %11 : vector<1x32xf32> to vector<16x32xf32>
    %13 = arith.mulf %10, %12 : vector<16x32xf32>
    %14 = arith.truncf %13 : vector<16x32xf32> to vector<16x32xbf16>
    %c0_5 = arith.constant 0 : index
    %c0_6 = arith.constant 0 : index
    %15 = vector.load %arg2[%c0_5, %c0_6] : memref<32x128xbf16, #tpu.memory_space<vmem>>, vector<32x128xbf16>
    %cst_7 = arith.constant dense<0.000000e+00> : vector<16x128xf32>
    %16 = tpu.matmul %14, %15, %cst_7 {dimension_numbers = #tpu.dot_dimension_numbers<[1], [0], [0], [1], [0, 0, 1, 1], [], []>} : vector<16x32xbf16>, vector<32x128xbf16>, vector<16x128xf32> -> vector<16x128xf32>
    %17 = vector.extract_strided_slice %16 {offsets = [0, 0], sizes = [16, 64], strides = [1, 1]} : vector<16x128xf32> to vector<16x64xf32>
    %c0_8 = arith.constant 0 : index
    %c0_9 = arith.constant 0 : index
    %18 = vector.load %arg8[%c0_8, %c0_9] : memref<16x64xf32, #tpu.memory_space<vmem>>, vector<16x64xf32>
    %19 = arith.mulf %17, %18 : vector<16x64xf32>
    %20 = vector.extract_strided_slice %16 {offsets = [0, 64], sizes = [16, 64], strides = [1, 1]} : vector<16x128xf32> to vector<16x64xf32>
    %c0_10 = arith.constant 0 : index
    %c0_11 = arith.constant 0 : index
    %21 = vector.load %arg9[%c0_10, %c0_11] : memref<16x64xf32, #tpu.memory_space<vmem>>, vector<16x64xf32>
    %22 = arith.mulf %20, %21 : vector<16x64xf32>
    %23 = arith.addf %19, %22 : vector<16x64xf32>
    %24 = arith.truncf %23 : vector<16x64xf32> to vector<16x64xbf16>
    %25 = vector.extract_strided_slice %24 {offsets = [0, 48], sizes = [16, 16], strides = [1, 1]} : vector<16x64xbf16> to vector<16x16xbf16>
    %c0_12 = arith.constant 0 : index
    %c0_13 = arith.constant 0 : index
    %26 = vector.load %arg3[%c0_12, %c0_13] : memref<16x128xbf16, #tpu.memory_space<vmem>>, vector<16x128xbf16>
    %cst_14 = arith.constant dense<0.000000e+00> : vector<16x128xf32>
    %27 = tpu.matmul %25, %26, %cst_14 {dimension_numbers = #tpu.dot_dimension_numbers<[1], [0], [0], [1], [0, 0, 1, 1], [], []>} : vector<16x16xbf16>, vector<16x128xbf16>, vector<16x128xf32> -> vector<16x128xf32>
    %28 = arith.truncf %27 : vector<16x128xf32> to vector<16x128xbf16>
    %c0_15 = arith.constant 0 : index
    %c0_16 = arith.constant 0 : index
    %29 = vector.load %arg10[%c0_15, %c0_16] : memref<32x16xf32, #tpu.memory_space<vmem>>, vector<32x16xf32>
    %cst_17 = arith.constant 0.000000e+00 : f32
    %30 = vector.broadcast %cst_17 : f32 to vector<16x32xf32>
    %31 = vector.extract_strided_slice %24 {offsets = [0, 32], sizes = [16, 8], strides = [1, 1]} : vector<16x64xbf16> to vector<16x8xbf16>
    %32 = vector.extract_strided_slice %24 {offsets = [0, 0], sizes = [16, 8], strides = [1, 1]} : vector<16x64xbf16> to vector<16x8xbf16>
    %33 = vector.extract_strided_slice %24 {offsets = [0, 8], sizes = [16, 8], strides = [1, 1]} : vector<16x64xbf16> to vector<16x8xbf16>
    %34 = tpu.concatenate %32, %33 in 0 : vector<16x8xbf16>, vector<16x8xbf16> -> vector<32x8xbf16>
    %cst_18 = arith.constant dense<0.000000e+00> : vector<32x16xf32>
    %35 = tpu.matmul %34, %31, %cst_18 {dimension_numbers = #tpu.dot_dimension_numbers<[1], [1], [0], [0], [0, 0, 1, 0], [], []>} : vector<32x8xbf16>, vector<16x8xbf16>, vector<32x16xf32> -> vector<32x16xf32>
    %36 = arith.addf %35, %29 : vector<32x16xf32>
    %cst_19 = arith.constant dense<0xFF800000> : vector<32xf32>
    %37 = vector.multi_reduction <maximumf>, %36, %cst_19 [1] : vector<32x16xf32> to vector<32xf32>
    %38 = vector.shape_cast %37 : vector<32xf32> to vector<32x1xf32>
    %39 = vector.broadcast %38 : vector<32x1xf32> to vector<32x16xf32>
    %40 = arith.subf %36, %39 : vector<32x16xf32>
    %41 = math.exp %40 : vector<32x16xf32>
    %cst_20 = arith.constant dense<0.000000e+00> : vector<32xf32>
    %42 = vector.multi_reduction <add>, %41, %cst_20 [1] : vector<32x16xf32> to vector<32xf32>
    %43 = vector.shape_cast %42 : vector<32xf32> to vector<32x1xf32>
    %44 = tpu.reciprocal %43 {approx = true} : vector<32x1xf32> -> vector<32x1xf32>
    %45 = vector.broadcast %44 : vector<32x1xf32> to vector<32x16xf32>
    %46 = arith.mulf %41, %45 : vector<32x16xf32>
    %47 = arith.truncf %46 : vector<32x16xf32> to vector<32x16xbf16>
    %48 = vector.extract_strided_slice %47 {offsets = [0, 0], sizes = [16, 16], strides = [1, 1]} : vector<32x16xbf16> to vector<16x16xbf16>
    %49 = vector.extract_strided_slice %28 {offsets = [0, 0], sizes = [16, 32], strides = [1, 1]} : vector<16x128xbf16> to vector<16x32xbf16>
    %cst_21 = arith.constant dense<0.000000e+00> : vector<16x32xf32>
    %50 = tpu.matmul %48, %49, %cst_21 {dimension_numbers = #tpu.dot_dimension_numbers<[1], [0], [0], [1], [0, 0, 1, 1], [], []>} : vector<16x16xbf16>, vector<16x32xbf16>, vector<16x32xf32> -> vector<16x32xf32>
    %51 = arith.addf %30, %50 : vector<16x32xf32>
    %52 = vector.extract_strided_slice %47 {offsets = [16, 0], sizes = [16, 16], strides = [1, 1]} : vector<32x16xbf16> to vector<16x16xbf16>
    %53 = vector.extract_strided_slice %28 {offsets = [0, 32], sizes = [16, 32], strides = [1, 1]} : vector<16x128xbf16> to vector<16x32xbf16>
    %cst_22 = arith.constant dense<0.000000e+00> : vector<16x32xf32>
    %54 = tpu.matmul %52, %53, %cst_22 {dimension_numbers = #tpu.dot_dimension_numbers<[1], [0], [0], [1], [0, 0, 1, 1], [], []>} : vector<16x16xbf16>, vector<16x32xbf16>, vector<16x32xf32> -> vector<16x32xf32>
    %55 = arith.addf %51, %54 : vector<16x32xf32>
    %56 = vector.extract_strided_slice %24 {offsets = [0, 40], sizes = [16, 8], strides = [1, 1]} : vector<16x64xbf16> to vector<16x8xbf16>
    %57 = vector.extract_strided_slice %24 {offsets = [0, 16], sizes = [16, 8], strides = [1, 1]} : vector<16x64xbf16> to vector<16x8xbf16>
    %58 = vector.extract_strided_slice %24 {offsets = [0, 24], sizes = [16, 8], strides = [1, 1]} : vector<16x64xbf16> to vector<16x8xbf16>
    %59 = tpu.concatenate %57, %58 in 0 : vector<16x8xbf16>, vector<16x8xbf16> -> vector<32x8xbf16>
    %cst_23 = arith.constant dense<0.000000e+00> : vector<32x16xf32>
    %60 = tpu.matmul %59, %56, %cst_23 {dimension_numbers = #tpu.dot_dimension_numbers<[1], [1], [0], [0], [0, 0, 1, 0], [], []>} : vector<32x8xbf16>, vector<16x8xbf16>, vector<32x16xf32> -> vector<32x16xf32>
    %61 = arith.addf %60, %29 : vector<32x16xf32>
    %cst_24 = arith.constant dense<0xFF800000> : vector<32xf32>
    %62 = vector.multi_reduction <maximumf>, %61, %cst_24 [1] : vector<32x16xf32> to vector<32xf32>
    %63 = vector.shape_cast %62 : vector<32xf32> to vector<32x1xf32>
    %64 = vector.broadcast %63 : vector<32x1xf32> to vector<32x16xf32>
    %65 = arith.subf %61, %64 : vector<32x16xf32>
    %66 = math.exp %65 : vector<32x16xf32>
    %cst_25 = arith.constant dense<0.000000e+00> : vector<32xf32>
    %67 = vector.multi_reduction <add>, %66, %cst_25 [1] : vector<32x16xf32> to vector<32xf32>
    %68 = vector.shape_cast %67 : vector<32xf32> to vector<32x1xf32>
    %69 = tpu.reciprocal %68 {approx = true} : vector<32x1xf32> -> vector<32x1xf32>
    %70 = vector.broadcast %69 : vector<32x1xf32> to vector<32x16xf32>
    %71 = arith.mulf %66, %70 : vector<32x16xf32>
    %72 = arith.truncf %71 : vector<32x16xf32> to vector<32x16xbf16>
    %73 = vector.extract_strided_slice %72 {offsets = [0, 0], sizes = [16, 16], strides = [1, 1]} : vector<32x16xbf16> to vector<16x16xbf16>
    %74 = vector.extract_strided_slice %28 {offsets = [0, 64], sizes = [16, 32], strides = [1, 1]} : vector<16x128xbf16> to vector<16x32xbf16>
    %cst_26 = arith.constant dense<0.000000e+00> : vector<16x32xf32>
    %75 = tpu.matmul %73, %74, %cst_26 {dimension_numbers = #tpu.dot_dimension_numbers<[1], [0], [0], [1], [0, 0, 1, 1], [], []>} : vector<16x16xbf16>, vector<16x32xbf16>, vector<16x32xf32> -> vector<16x32xf32>
    %76 = arith.addf %55, %75 : vector<16x32xf32>
    %77 = vector.extract_strided_slice %72 {offsets = [16, 0], sizes = [16, 16], strides = [1, 1]} : vector<32x16xbf16> to vector<16x16xbf16>
    %78 = vector.extract_strided_slice %28 {offsets = [0, 96], sizes = [16, 32], strides = [1, 1]} : vector<16x128xbf16> to vector<16x32xbf16>
    %cst_27 = arith.constant dense<0.000000e+00> : vector<16x32xf32>
    %79 = tpu.matmul %77, %78, %cst_27 {dimension_numbers = #tpu.dot_dimension_numbers<[1], [0], [0], [1], [0, 0, 1, 1], [], []>} : vector<16x16xbf16>, vector<16x32xbf16>, vector<16x32xf32> -> vector<16x32xf32>
    %80 = arith.addf %76, %79 : vector<16x32xf32>
    %81 = arith.addf %0, %80 : vector<16x32xf32>
    %82 = arith.mulf %81, %81 : vector<16x32xf32>
    %cst_28 = arith.constant dense<0.000000e+00> : vector<16xf32>
    %83 = vector.multi_reduction <add>, %82, %cst_28 [1] : vector<16x32xf32> to vector<16xf32>
    %84 = vector.shape_cast %83 : vector<16xf32> to vector<16x1xf32>
    %cst_29 = arith.constant 3.200000e+01 : f32
    %85 = vector.broadcast %cst_29 : f32 to vector<16x1xf32>
    %86 = arith.divf %84, %85 : vector<16x1xf32>
    %cst_30 = arith.constant 9.99999997E-7 : f32
    %87 = vector.broadcast %cst_30 : f32 to vector<16x1xf32>
    %88 = arith.addf %86, %87 : vector<16x1xf32>
    %89 = math.rsqrt %88 : vector<16x1xf32>
    %90 = vector.broadcast %89 : vector<16x1xf32> to vector<16x32xf32>
    %91 = arith.mulf %81, %90 : vector<16x32xf32>
    %c0_31 = arith.constant 0 : index
    %c0_32 = arith.constant 0 : index
    %92 = vector.load %arg7[%c0_31, %c0_32] : memref<1x32xf32, #tpu.memory_space<vmem>>, vector<1x32xf32>
    %93 = vector.broadcast %92 : vector<1x32xf32> to vector<16x32xf32>
    %94 = arith.mulf %91, %93 : vector<16x32xf32>
    %95 = arith.truncf %94 : vector<16x32xf32> to vector<16x32xbf16>
    %c0_33 = arith.constant 0 : index
    %c0_34 = arith.constant 0 : index
    %96 = vector.load %arg4[%c0_33, %c0_34] : memref<32x128xbf16, #tpu.memory_space<vmem>>, vector<32x128xbf16>
    %cst_35 = arith.constant dense<0.000000e+00> : vector<16x128xf32>
    %97 = tpu.matmul %95, %96, %cst_35 {dimension_numbers = #tpu.dot_dimension_numbers<[1], [0], [0], [1], [0, 0, 1, 1], [], []>} : vector<16x32xbf16>, vector<32x128xbf16>, vector<16x128xf32> -> vector<16x128xf32>
    %98 = vector.extract_strided_slice %97 {offsets = [0, 0], sizes = [16, 64], strides = [1, 1]} : vector<16x128xf32> to vector<16x64xf32>
    %99 = vector.extract_strided_slice %97 {offsets = [0, 64], sizes = [16, 64], strides = [1, 1]} : vector<16x128xf32> to vector<16x64xf32>
    %100 = arith.negf %98 : vector<16x64xf32>
    %101 = math.exp %100 : vector<16x64xf32>
    %cst_36 = arith.constant 1.000000e+00 : f32
    %102 = vector.broadcast %cst_36 : f32 to vector<16x64xf32>
    %103 = arith.addf %102, %101 : vector<16x64xf32>
    %104 = arith.divf %102, %103 : vector<16x64xf32>
    %105 = arith.mulf %98, %104 : vector<16x64xf32>
    %106 = arith.mulf %105, %99 : vector<16x64xf32>
    %107 = arith.truncf %106 : vector<16x64xf32> to vector<16x64xbf16>
    %c0_37 = arith.constant 0 : index
    %c0_38 = arith.constant 0 : index
    %108 = vector.load %arg5[%c0_37, %c0_38] : memref<64x32xbf16, #tpu.memory_space<vmem>>, vector<64x32xbf16>
    %cst_39 = arith.constant dense<0.000000e+00> : vector<16x32xf32>
    %109 = tpu.matmul %107, %108, %cst_39 {dimension_numbers = #tpu.dot_dimension_numbers<[1], [0], [0], [1], [0, 0, 1, 1], [], []>} : vector<16x64xbf16>, vector<64x32xbf16>, vector<16x32xf32> -> vector<16x32xf32>
    %110 = arith.addf %81, %109 : vector<16x32xf32>
    %c0_40 = arith.constant 0 : index
    %c0_41 = arith.constant 0 : index
    %111 = vector.load %arg11[%c0_40, %c0_41] : memref<16x32xf32, #tpu.memory_space<vmem>>, vector<16x32xf32>
    tpu.vector_store %arg11[%c0_40, %c0_41], %110 {strides = array<i32>} : memref<16x32xf32, #tpu.memory_space<vmem>>, vector<16x32xf32>,
    return
  }
  func.func @transform_0(%arg0: i32) -> (i32, i32) {
    %c0_i32 = arith.constant 0 : i32
    %c0_i32_0 = arith.constant 0 : i32
    %c0_i32_1 = arith.constant 0 : i32
    return %c0_i32, %c0_i32_0 : i32, i32
  }
  func.func @transform_1(%arg0: i32) -> (i32, i32) {
    %c0_i32 = arith.constant 0 : i32
    %c0_i32_0 = arith.constant 0 : i32
    %c0_i32_1 = arith.constant 0 : i32
    return %c0_i32, %c0_i32_0 : i32, i32
  }
  func.func @transform_2(%arg0: i32) -> (i32, i32) {
    %c0_i32 = arith.constant 0 : i32
    %c0_i32_0 = arith.constant 0 : i32
    %c0_i32_1 = arith.constant 0 : i32
    return %c0_i32, %c0_i32_0 : i32, i32
  }
  func.func @transform_3(%arg0: i32) -> (i32, i32) {
    %c0_i32 = arith.constant 0 : i32
    %c0_i32_0 = arith.constant 0 : i32
    %c0_i32_1 = arith.constant 0 : i32
    return %c0_i32, %c0_i32_0 : i32, i32
  }
  func.func @transform_4(%arg0: i32) -> (i32, i32) {
    %c0_i32 = arith.constant 0 : i32
    %c0_i32_0 = arith.constant 0 : i32
    %c0_i32_1 = arith.constant 0 : i32
    return %c0_i32, %c0_i32_0 : i32, i32
  }
  func.func @transform_5(%arg0: i32) -> (i32, i32) {
    %c0_i32 = arith.constant 0 : i32
    %c0_i32_0 = arith.constant 0 : i32
    %c0_i32_1 = arith.constant 0 : i32
    return %c0_i32, %c0_i32_0 : i32, i32
  }
  func.func @transform_6(%arg0: i32) -> (i32, i32) {
    %c0_i32 = arith.constant 0 : i32
    %c0_i32_0 = arith.constant 0 : i32
    %c0_i32_1 = arith.constant 0 : i32
    return %c0_i32, %c0_i32_0 : i32, i32
  }
  func.func @transform_7(%arg0: i32) -> (i32, i32) {
    %c0_i32 = arith.constant 0 : i32
    %c0_i32_0 = arith.constant 0 : i32
    %c0_i32_1 = arith.constant 0 : i32
    return %c0_i32, %c0_i32_0 : i32, i32
  }
  func.func @transform_8(%arg0: i32) -> (i32, i32) {
    %c0_i32 = arith.constant 0 : i32
    %c0_i32_0 = arith.constant 0 : i32
    %c0_i32_1 = arith.constant 0 : i32
    return %c0_i32, %c0_i32_0 : i32, i32
  }
  func.func @transform_9(%arg0: i32) -> (i32, i32) {
    %c0_i32 = arith.constant 0 : i32
    %c0_i32_0 = arith.constant 0 : i32
    %c0_i32_1 = arith.constant 0 : i32
    return %c0_i32, %c0_i32_0 : i32, i32
  }
  func.func @transform_10(%arg0: i32) -> (i32, i32) {
    %c0_i32 = arith.constant 0 : i32
    %c0_i32_0 = arith.constant 0 : i32
    %c0_i32_1 = arith.constant 0 : i32
    return %c0_i32, %c0_i32_0 : i32, i32
  }
}

</mosaic_0001>

<bundles_post_ra>
// kernel: llama_decoder_layer.1
= control target key start
LH: loop header
LB: loop body
LE: loop exit
PB: predicated region body
PF: predicated region fallthrough
CT: control target
= control target key end

     0   :  { %15 = vsyncpa [#allocation3], 0  ;;  %s1080_s0 = inlined_call_operand.vmem [shape: f32[16,32], index: 0, kind: input, shape index: {}]   ;;  %s1081_s1 = inlined_call_operand.vmem [shape: bf16[32,128], index: 1, kind: input, shape index: {}]   ;;  %s1082_s2 = inlined_call_operand.hbm [shape: bf16[16,128], index: 2, kind: input, shape index: {}]   ;;  %s1083_s3 = inlined_call_operand.vmem [shape: bf16[32,128], index: 3, kind: input, shape index: {}]   ;;  %s1084_s4 = inlined_call_operand.vmem [shape: bf16[64,32], index: 4, kind: input, shape index: {}]   ;;  %s1085_s5 = inlined_call_operand.vmem [shape: f32[1,32], index: 5, kind: input, shape index: {}]   ;;  %s1086_s6 = inlined_call_operand.vmem [shape: f32[1,32], index: 6, kind: input, shape index: {}]   ;;  %s1087_s7 = inlined_call_operand.vmem [shape: f32[16,64], index: 7, kind: input, shape index: {}]   ;;  %s1088_s8 = inlined_call_operand.vmem [shape: f32[16,64], index: 8, kind: input, shape index: {}]   ;;  %s1089_s9 = inlined_call_operand.vmem [shape: f32[32,16], index: 9, kind: input, shape index: {}]   ;;  %s1090_s10 = inlined_call_operand.hbm [shape: f32[16,32], index: 10, kind: output, shape index: {}]  }
   0x1   :  { %16 = vsyncpa [#allocation4], 0  ;;  %s25_s15 = sshll.u32 %s1082_s2, 4  ;;  %s850_s16 = smov [#allocation2]   ;;  %s26_s15 = int_to_ptr.hbm [resolvable:$true] %s25_s15 }
   0x2   :  { %s27_s17 = sshll.u32 %s850_s16, 4  ;;  %s851_s18 = smov 64   ;;  %s28_s17 = int_to_ptr.vmem [resolvable:$true] %s27_s17 }
   0x3   :  { %s852_s19 = smov 4  }
   0x4   :  { %33 = dma.hbm_to_vmem [thread:$0]  %s26_s15, 128, %s28_s17, [#allocation3], %s851_s18, %s851_s18, %s852_s19  }
   0x5   :  { %846 = dma.done.wait [#allocation3], 128  }
   0x6   :  { %847 = vsyncadd [#allocation3], 4294967168  ;;  %v926_v0 = vld [vmem:[%s1080_s0] sm:$0xff]  ;;  %vm57_vm0 = vcmask 261120   ;;  %v933_v2 = vld [vmem:[%s1080_s0 + $0x8] sm:$0xff]  ;;  %v853_v6 = vmov 32.0  }
   0x7   :  { %v55_v1 = vmul.f32 %v926_v0, %v926_v0  ;;  %v56_v4 = vmul.f32 %v933_v2, %v933_v2  ;;  %748 = vrcp.f32 %v853_v6  ;;  %v725_v12 = vld [vmem:[%s1081_s1 + $0x8] sm:$0xff]  ;;  %v724_v14 = vld [vmem:[%s1081_s1] sm:$0xff]  ;;  %s854_s13 = smov 80   ;;  %s855_s14 = smov 120   ;;  %vm180_vm8 = vcmask 130048  }
   0x8   :  { %129 = vmatpush.bf16.msra.mxu0 %v725_v12  ;;  %v141_v18 = vld [vmem:[%s1088_s8] sm:$0xff]  ;;  %v142_v23 = vld [vmem:[%s1088_s8 + $0x8] sm:$0xff]  ;;  %s856_s15 = smov 96   ;;  %vm208_vm9 = vcmask 64512   ;;  %s857_s20 = smov 112  }
   0x9   :  { %v58_v3 = vsel %vm57_vm0, %v55_v1, 0.0  ;;  %v61_v5 = vsel %vm57_vm0, %v56_v4, 0.0  ;;  %145 = vrot.lane.b32.xlu1 %v141_v18, %s851_s18  ;;  %v746_v37 = vld [vmem:[%s1085_s5] ss:$0 sm:$0xff]  ;;  %v138_v53 = vld [vmem:[%s1087_s7 + $0x8] sm:$0xff]  ;;  %s858_s21 = smov 88  }
   0xa   :  { %59 = vadd.xlane.f32.xlu0 %v58_v3  ;;  %v726_v49 = vld [vmem:[#allocation2] sm:$0xff]  ;;  %s862_s16 = smov 8  }
   0xb   :  { %191 = vmatpush.bf16.msra.mxu1 %v726_v49  ;;  %v137_v50 = vld [vmem:[%s1087_s7] sm:$0xff]  ;;  %s861_s7 = smov 128  }
   0xc   :  { %130 = vmatpush.bf16.msra.mxu0 %v724_v14 }
   0xd   :  { %v749_v7 = vpop.eup %748 }
   0xe   :  { %v65_v8 = vmul.f32 32.0, %v749_v7  ;;  %vm69_vm1 = vweird.f32 %v749_v7 }
  0x10   :  { %v66_v9 = vsub.f32 1.0, %v65_v8 }
  0x11   :  { %147 = vrot.lane.b32.xlu1 %v142_v23, %s851_s18 }
  0x12   :  { %62 = vadd.xlane.f32.xlu0 %v61_v5  ;;  %v67_v10 = vmul.f32 %v749_v7, %v66_v9 }
  0x14   :  { %v68_v11 = vadd.f32 %v749_v7, %v67_v10 }
  0x16   :  { %v942_v13 = vsel %vm69_vm1, %v749_v7, %v68_v11 }
  0x7b   :  { %v146_v43 = vpop.permute.xlu1 %145 }
  0x7d   :  { %v60_v15 = vpop.xlane.xlu0 %59 }
  0x7e   :  { %v71_v16 = vmul.f32 %v942_v13, %v60_v15  ;;  %v982_v15 = vld [vmem:[%s1089_s9 + $0x10] sm:$0xff] }
  0x80   :  { %v73_v17 = vadd.f32 1e-06, %v71_v16 }
  0x82   :  { %750 = vrsqrt.f32 %v73_v17  ;;  %vm81_vm3 = vweird.f32 %v73_v17 }
  0x83   :  { %v148_v46 = vpop.permute.xlu1 %147 }
  0x85   :  { %v63_v19 = vpop.xlane.xlu0 %62 }
  0x86   :  { %v72_v20 = vmul.f32 %v942_v13, %v63_v19  ;;  %v989_v19 = vld [vmem:[%s1089_s9 + $0x18] sm:$0xff] }
  0x88   :  { %v751_v21 = vpop.eup %750  ;;  %v74_v22 = vadd.f32 1e-06, %v72_v20 }
  0x89   :  { %v76_v24 = vmul.f32 %v751_v21, %v73_v17  ;;  %vm82_vm2 = vweird.f32 %v751_v21 }
  0x8a   :  { %752 = vrsqrt.f32 %v74_v22  ;;  %vm83_vm4 = vmor %vm81_vm3, %vm82_vm2  ;;  %vm91_vm6 = vweird.f32 %v74_v22 }
  0x8b   :  { %v77_v25 = vmul.f32 %v751_v21, %v76_v24 }
  0x8d   :  { %v78_v26 = vmul.f32 0.5, %v77_v25 }
  0x8f   :  { %v79_v27 = vsub.f32 1.5, %v78_v26 }
  0x90   :  { %v753_v28 = vpop.eup %752 }
  0x91   :  { %v86_v29 = vmul.f32 %v753_v28, %v74_v22  ;;  %v80_v30 = vmul.f32 %v751_v21, %v79_v27  ;;  %vm92_vm5 = vweird.f32 %v753_v28 }
  0x92   :  { %vm93_vm7 = vmor %vm91_vm6, %vm92_vm5 }
  0x93   :  { %v87_v31 = vmul.f32 %v753_v28, %v86_v29  ;;  %v84_v33 = vsel %vm83_vm4, %v751_v21, %v80_v30 }
  0x94   :  { %v95_v36 = vmul.f32 %v84_v33, %v926_v0 }
  0x95   :  { %v88_v32 = vmul.f32 0.5, %v87_v31 }
  0x96   :  { %v101_v40 = vmul.f32 %v746_v37, %v95_v36 }
  0x97   :  { %v89_v34 = vsub.f32 1.5, %v88_v32 }
  0x99   :  { %v90_v35 = vmul.f32 %v753_v28, %v89_v34  ;;  %v201_v34 = vld [vmem:[%s1089_s9 + $0x8] sm:$0xff] }
  0x9b   :  { %v94_v38 = vsel %vm93_vm7, %v753_v28, %v90_v35 }
  0x9c   :  { %v96_v39 = vmul.f32 %v94_v38, %v933_v2 }
  0x9e   :  { %v102_v41 = vmul.f32 %v746_v37, %v96_v39  ;;  %v200_v37 = vld [vmem:[%s1089_s9] sm:$0xff]  ;;  %s859_s9 = smov 32  }
  0xa0   :  { %v103_v42 = vpack.c.bf16 %v102_v41, %v101_v40 }
  0xa2   :  { %682 = vmatmul.msk.bf16.vlgmr.msra.gmra.mxu0 %vm57_vm0, %v103_v42 }
 0x11f   :  { %v132_v44 = vpop.f32.mrf.mxu0 }
 0x120   :  { %v151_v45 = vmul.f32 %v146_v43, %v132_v44  ;;  %v139_v52 = vmul.f32 %v137_v50, %v132_v44 }
 0x122   :  { %155 = vrot.lane.b32.xlu2 %v151_v45, %s851_s18 }
 0x127   :  { %v134_v47 = vpop.f32.mrf.mxu0 }
 0x128   :  { %v152_v48 = vmul.f32 %v148_v46, %v134_v47  ;;  %v140_v55 = vmul.f32 %v138_v53, %v134_v47 }
 0x12a   :  { %157 = vrot.lane.b32.xlu2 %v152_v48, %s851_s18 }
 0x17c   :  { %v156_v51 = vpop.permute.xlu2 %155 }
 0x17d   :  { %v161_v54 = vadd.f32 %v156_v51, %v139_v52 }
 0x17f   :  { %v163_v57 = vpack.c.bf16 %v161_v54, %v161_v54 }
 0x181   :  { %v169_v60 = vunpack.c.l.b16 %v163_v57 }
 0x184   :  { %v158_v56 = vpop.permute.xlu2 %157 }
 0x185   :  { %v162_v58 = vadd.f32 %v158_v56, %v140_v55 }
 0x187   :  { %v164_v59 = vpack.c.bf16 %v162_v58, %v162_v58 }
 0x189   :  { %v170_v61 = vunpack.c.l.b16 %v164_v59 }
 0x18b   :  { %v171_v62 = vpack.c.b16 %v170_v61, %v169_v60 }
 0x18d   :  { %172 = vrot.lane.b32.xlu2 %v171_v62, %s854_s13  ;;  %204 = vrot.lane.b32.xlu1 %v171_v62, %s855_s14 }
 0x18e   :  { %206 = vrot.lane.b32.xlu0 %v171_v62, %s856_s15 }
 0x1e7   :  { %v173_v63 = vpop.permute.xlu2 %172 }
 0x1e8   :  { %687 = vmatmul.msk.bf16.vlgmr.msra.gmra.mxu1 %vm180_vm8, %v173_v63 }
 0x1ff   :  { %v205_v4 = vpop.permute.xlu1 %204 }
 0x200   :  { %v207_v1 = vpop.permute.xlu0 %206 }
 0x201   :  { %v216_v3 = vsel %vm208_vm9, %v207_v1, 0 }
 0x202   :  { %225 = vmatpush.bf16.xpose.msra.mxu2 %v216_v3 }
 0x209   :  { %688 = vmatmul.msk.bf16.vlgmr.msra.gmra.mxu2 %vm208_vm9, %v171_v62 }
 0x219   :  { %689 = vmatmul.msk.bf16.gmra.mxu2 %vm208_vm9, %v205_v4 }
 0x265   :  { %v193_v5 = vpop.f32.mrf.mxu1 }
 0x266   :  { %v198_v6 = vpack.c.bf16 %v193_v5, %v193_v5 }
 0x268   :  { %v292_v9 = vunpack.c.l.b16 %v198_v6 }
 0x26d   :  { %v195_v7 = vpop.f32.mrf.mxu1 }
 0x26e   :  { %v199_v8 = vpack.c.bf16 %v195_v7, %v195_v7 }
 0x270   :  { %v293_v10 = vunpack.c.l.b16 %v199_v8 }
 0x272   :  { %v976_v11 = vpack.c.b16 %v293_v10, %v292_v9 }
 0x274   :  { %331 = vmatpush.bf16.msrb.mxu1 %v976_v11 }
 0x28c   :  { %v227_v12 = vpop.f32.mrf.mxu2 }
 0x28d   :  { %v228_v38 = vadd.f32 %v227_v12, %v200_v37 }
 0x28f   :  { %v237_v39 = vsel %vm180_vm8, %v228_v38, -inf }
 0x294   :  { %v229_v14 = vpop.f32.mrf.mxu2 }
 0x295   :  { %v230_v35 = vadd.f32 %v229_v14, %v201_v34 }
 0x297   :  { %v240_v36 = vsel %vm180_vm8, %v230_v35, -inf }
 0x29c   :  { %v232_v16 = vpop.f32.mrf.mxu2 }
 0x29d   :  { %v233_v17 = vadd.f32 %v232_v16, %v982_v15 }
 0x29f   :  { %v243_v18 = vsel %vm180_vm8, %v233_v17, -inf }
 0x2a0   :  { %244 = vmax.xlane.f32.xlu1 %v243_v18 }
 0x2a4   :  { %v234_v20 = vpop.f32.mrf.mxu2 }
 0x2a5   :  { %v235_v21 = vadd.f32 %v234_v20, %v989_v19 }
 0x2a7   :  { %v246_v22 = vsel %vm180_vm8, %v235_v21, -inf }
 0x2a8   :  { %247 = vmax.xlane.f32.xlu2 %v246_v22 }
 0x2b9   :  { %295 = vrot.lane.b32.xlu1 %v976_v11, %s856_s15  ;;  %s661_s15 = sshll.u32 %s1090_s10, 4  ;;  %s662_s15 = int_to_ptr.hbm [resolvable:$true] %s661_s15 }
 0x2c1   :  { %340 = vrot.lane.b32.xlu1 %v205_v4, %s857_s20 }
 0x313   :  { %v245_v23 = vpop.xlane.xlu1 %244 }
 0x314   :  { %v251_v24 = vsub.f32 %v233_v17, %v245_v23 }
 0x316   :  { %v257_v25 = vmul.f32 1.442695, %v251_v24 }
 0x318   :  { %754 = vpow2.f32 %v257_v25 }
 0x31b   :  { %v248_v26 = vpop.xlane.xlu2 %247 }
 0x31c   :  { %v252_v27 = vsub.f32 %v235_v21, %v248_v26 }
 0x31e   :  { %v755_v28 = vpop.eup %754  ;;  %v259_v29 = vmul.f32 1.442695, %v252_v27 }
 0x31f   :  { %v267_v30 = vsel %vm180_vm8, %v755_v28, 0.0 }
 0x320   :  { %756 = vpow2.f32 %v259_v29  ;;  %268 = vadd.xlane.f32.xlu0 %v267_v30 }
 0x326   :  { %v757_v31 = vpop.eup %756 }
 0x327   :  { %v270_v32 = vsel %vm180_vm8, %v757_v31, 0.0 }
 0x328   :  { %271 = vadd.xlane.f32.xlu2 %v270_v32 }
 0x32b   :  { %v296_v33 = vpop.permute.xlu1 %295 }
 0x32c   :  { %308 = vmatpush.bf16.msra.mxu3 %v296_v33 }
 0x333   :  { %v341_v54 = vpop.permute.xlu1 %340 }
 0x334   :  { %338 = vrot.lane.b32.xlu0 %v171_v62, %s857_s20 }
 0x340   :  { %342 = vrot.lane.b32.xlu2 %v171_v62, %s858_s21 }
 0x35e   :  { %241 = vmax.xlane.f32.xlu0 %v240_v36 }
 0x369   :  { %238 = vmax.xlane.f32.xlu2 %v237_v39 }
 0x393   :  { %v269_v40 = vpop.xlane.xlu0 %268 }
 0x394   :  { %758 = vrcp.f32 %v269_v40 }
 0x39a   :  { %v759_v42 = vpop.eup %758 }
 0x39b   :  { %v272_v41 = vpop.xlane.xlu2 %271  ;;  %v279_v43 = vmul.f32 %v759_v42, %v755_v28 }
 0x39c   :  { %760 = vrcp.f32 %v272_v41 }
 0x39d   :  { %v283_v47 = vpack.c.bf16 %v279_v43, %v279_v43 }
 0x39f   :  { %v287_v50 = vunpack.c.l.b16 %v283_v47 }
 0x3a2   :  { %v761_v44 = vpop.eup %760 }
 0x3a3   :  { %v343_v45 = vpop.permute.xlu2 %342  ;;  %v280_v46 = vmul.f32 %v761_v44, %v757_v31 }
 0x3a4   :  { %v351_v48 = vsel %vm208_vm9, %v343_v45, 0 }
 0x3a5   :  { %360 = vmatpush.bf16.xpose.msrb.mxu3 %v351_v48  ;;  %v284_v49 = vpack.c.bf16 %v280_v46, %v280_v46 }
 0x3a6   :  { %v339_v53 = vpop.permute.xlu0 %338 }
 0x3a7   :  { %v288_v51 = vunpack.c.l.b16 %v284_v49 }
 0x3a9   :  { %v289_v52 = vpack.c.b16 %v288_v51, %v287_v50 }
 0x3ab   :  { %690 = vmatmul.msk.bf16.vlgmr.msra.gmra.mxu3 %vm180_vm8, %v289_v52 }
 0x3bb   :  { %692 = vmatmul.msk.bf16.vlgmr.msrb.gmra.mxu3 %vm208_vm9, %v339_v53 }
 0x3cb   :  { %693 = vmatmul.msk.bf16.gmra.mxu3 %vm208_vm9, %v341_v54  ;;  %vm633_vm9 = vcmask 523264  }
 0x3d1   :  { %v242_v63 = vpop.xlane.xlu0 %241 }
 0x3d2   :  { %v250_v4 = vsub.f32 %v230_v35, %v242_v63 }
 0x3d4   :  { %v255_v6 = vmul.f32 1.442695, %v250_v4 }
 0x3dc   :  { %v239_v57 = vpop.xlane.xlu2 %238 }
 0x3dd   :  { %v249_v60 = vsub.f32 %v228_v38, %v239_v57 }
 0x3df   :  { %v253_v62 = vmul.f32 1.442695, %v249_v60 }
 0x3e1   :  { %762 = vpow2.f32 %v253_v62 }
 0x3e2   :  { %764 = vpow2.f32 %v255_v6 }
 0x3e7   :  { %v763_v7 = vpop.eup %762 }
 0x3e8   :  { %v261_v12 = vsel %vm180_vm8, %v763_v7, 0.0  ;;  %v765_v14 = vpop.eup %764 }
 0x3e9   :  { %v264_v20 = vsel %vm180_vm8, %v765_v14, 0.0 }
 0x42e   :  { %v1009_v55 = vpop.f32.mrf.mxu3 }
 0x436   :  { %v1011_v56 = vpop.f32.mrf.mxu3 }
 0x43e   :  { %v362_v58 = vpop.f32.mrf.mxu3 }
 0x43f   :  { %v363_v59 = vadd.f32 %v362_v58, %v200_v37 }
 0x441   :  { %v372_v61 = vsel %vm180_vm8, %v363_v59, -inf }
 0x442   :  { %373 = vmax.xlane.f32.xlu1 %v372_v61 }
 0x446   :  { %v364_v1 = vpop.f32.mrf.mxu3 }
 0x447   :  { %v365_v3 = vadd.f32 %v364_v1, %v201_v34 }
 0x449   :  { %v375_v5 = vsel %vm180_vm8, %v365_v3, -inf }
 0x44a   :  { %376 = vmax.xlane.f32.xlu2 %v375_v5 }
 0x44e   :  { %v367_v8 = vpop.f32.mrf.mxu3 }
 0x44f   :  { %v368_v9 = vadd.f32 %v367_v8, %v982_v15 }
 0x451   :  { %v378_v10 = vsel %vm180_vm8, %v368_v9, -inf }
 0x452   :  { %379 = vmax.xlane.f32.xlu0 %v378_v10  ;;  %262 = vadd.xlane.f32.xlu2 %v261_v12 }
 0x456   :  { %v369_v16 = vpop.f32.mrf.mxu3 }
 0x457   :  { %v370_v17 = vadd.f32 %v369_v16, %v989_v19 }
 0x459   :  { %v381_v18 = vsel %vm180_vm8, %v370_v17, -inf }
 0x45a   :  { %382 = vmax.xlane.f32.xlu1 %v381_v18  ;;  %265 = vadd.xlane.f32.xlu0 %v264_v20 }
 0x4b5   :  { %v374_v21 = vpop.xlane.xlu1 %373 }
 0x4b6   :  { %v384_v22 = vsub.f32 %v363_v59, %v374_v21 }
 0x4b8   :  { %v388_v15 = vmul.f32 1.442695, %v384_v22 }
 0x4ba   :  { %766 = vpow2.f32 %v388_v15 }
 0x4bd   :  { %v377_v23 = vpop.xlane.xlu2 %376 }
 0x4be   :  { %v385_v24 = vsub.f32 %v365_v3, %v377_v23 }
 0x4c0   :  { %v767_v25 = vpop.eup %766  ;;  %v390_v26 = vmul.f32 1.442695, %v385_v24 }
 0x4c1   :  { %v396_v27 = vsel %vm180_vm8, %v767_v25, 0.0 }
 0x4c2   :  { %768 = vpow2.f32 %v390_v26  ;;  %397 = vadd.xlane.f32.xlu1 %v396_v27 }
 0x4c5   :  { %v380_v28 = vpop.xlane.xlu0 %379  ;;  %v263_v19 = vpop.xlane.xlu2 %262 }
 0x4c6   :  { %v386_v29 = vsub.f32 %v368_v9, %v380_v28  ;;  %770 = vrcp.f32 %v263_v19 }
 0x4c8   :  { %v769_v30 = vpop.eup %768  ;;  %v392_v31 = vmul.f32 1.442695, %v386_v29 }
 0x4c9   :  { %v399_v32 = vsel %vm180_vm8, %v769_v30, 0.0 }
 0x4ca   :  { %772 = vpow2.f32 %v392_v31  ;;  %400 = vadd.xlane.f32.xlu2 %v399_v32  ;;  %v727_v32 = vld [vmem:[%s1083_s3] sm:$0xff] }
 0x4cc   :  { %v771_v35 = vpop.eup %770 }
 0x4cd   :  { %v383_v33 = vpop.xlane.xlu1 %382  ;;  %v266_v34 = vpop.xlane.xlu0 %265  ;;  %v277_v39 = vmul.f32 %v771_v35, %v763_v7 }
 0x4ce   :  { %v387_v36 = vsub.f32 %v370_v17, %v383_v33  ;;  %774 = vrcp.f32 %v266_v34 }
 0x4cf   :  { %v281_v42 = vpack.c.bf16 %v277_v39, %v277_v39 }
 0x4d0   :  { %v773_v37 = vpop.eup %772  ;;  %v394_v38 = vmul.f32 1.442695, %v387_v36 }
 0x4d1   :  { %v402_v40 = vsel %vm180_vm8, %v773_v37, 0.0  ;;  %v317_v46 = vunpack.c.l.b16 %v281_v42 }
 0x4d2   :  { %776 = vpow2.f32 %v394_v38  ;;  %403 = vadd.xlane.f32.xlu0 %v402_v40 }
 0x4d4   :  { %v775_v41 = vpop.eup %774 }
 0x4d5   :  { %v278_v43 = vmul.f32 %v775_v41, %v765_v14 }
 0x4d7   :  { %v282_v44 = vpack.c.bf16 %v278_v43, %v278_v43 }
 0x4d8   :  { %v777_v45 = vpop.eup %776 }
 0x4d9   :  { %v318_v47 = vunpack.c.l.b16 %v282_v44  ;;  %v405_v48 = vsel %vm180_vm8, %v777_v45, 0.0 }
 0x4da   :  { %406 = vadd.xlane.f32.xlu1 %v405_v48 }
 0x4db   :  { %v319_v49 = vpack.c.b16 %v318_v47, %v317_v46 }
 0x4dd   :  { %691 = vmatmul.msk.bf16.vlgmr.msrb.gmra.mxu1 %vm180_vm8, %v319_v49 }
 0x4e2   :  { %425 = vrot.lane.b32.xlu2 %v976_v11, %s851_s18 }
 0x4e6   :  { %452 = vrot.lane.b32.xlu0 %v976_v11, %s859_s9 }
 0x535   :  { %v398_v50 = vpop.xlane.xlu1 %397 }
 0x536   :  { %778 = vrcp.f32 %v398_v50 }
 0x53c   :  { %v779_v52 = vpop.eup %778 }
 0x53d   :  { %v401_v51 = vpop.xlane.xlu2 %400  ;;  %v412_v53 = vmul.f32 %v779_v52, %v767_v25 }
 0x53e   :  { %780 = vrcp.f32 %v401_v51 }
 0x53f   :  { %v416_v57 = vpack.c.bf16 %v412_v53, %v412_v53 }
 0x541   :  { %v422_v62 = vunpack.c.l.b16 %v416_v57 }
 0x544   :  { %v781_v54 = vpop.eup %780 }
 0x545   :  { %v413_v58 = vmul.f32 %v781_v54, %v769_v30  ;;  %v404_v59 = vpop.xlane.xlu0 %403  ;;  %v426_v60 = vpop.permute.xlu2 %425 }
 0x546   :  { %438 = vmatpush.bf16.msrb.mxu0 %v426_v60  ;;  %782 = vrcp.f32 %v404_v59  ;;  %v732_v59 = vld [vmem:[%s1084_s4 + $0x18] sm:$0xff] }
 0x547   :  { %v417_v61 = vpack.c.bf16 %v413_v58, %v413_v58  ;;  %641 = vmatpush.bf16.msrb.mxu2 %v732_v59 }
 0x549   :  { %v423_v63 = vunpack.c.l.b16 %v417_v61 }
 0x54b   :  { %v424_v1 = vpack.c.b16 %v423_v63, %v422_v62 }
 0x54c   :  { %v783_v11 = vpop.eup %782 }
 0x54d   :  { %v407_v3 = vpop.xlane.xlu1 %406  ;;  %694 = vmatmul.msk.bf16.vlgmr.msrb.gmra.mxu0 %vm180_vm8, %v424_v1  ;;  %v414_v4 = vmul.f32 %v783_v11, %v773_v37  ;;  %v731_v1 = vld [vmem:[%s1084_s4 + $0x10] sm:$0xff]  ;;  %v730_v11 = vld [vmem:[%s1084_s4 + $0x8] sm:$0xff] }
 0x54e   :  { %784 = vrcp.f32 %v407_v3  ;;  %642 = vmatpush.bf16.msrb.mxu2 %v731_v1 }
 0x54f   :  { %v418_v6 = vpack.c.bf16 %v414_v4, %v414_v4 }
 0x551   :  { %v449_v10 = vunpack.c.l.b16 %v418_v6  ;;  %v729_v6 = vld [vmem:[%s1084_s4] sm:$0xff]  ;;  %s860_s4 = smov [#allocation5]  }
 0x552   :  { %643 = vmatpush.bf16.msrb.mxu2 %v730_v11  ;;  %s659_s12 = sshll.u32 %s860_s4, 4  ;;  %s660_s12 = int_to_ptr.vmem [resolvable:$true] %s659_s12 }
 0x554   :  { %v785_v5 = vpop.eup %784 }
 0x555   :  { %v415_v7 = vmul.f32 %v785_v5, %v777_v45 }
 0x556   :  { %644 = vmatpush.bf16.msrb.mxu2 %v729_v6 }
 0x557   :  { %v419_v8 = vpack.c.bf16 %v415_v7, %v415_v7 }
 0x558   :  { %v453_v9 = vpop.permute.xlu0 %452 }
 0x559   :  { %v450_v12 = vunpack.c.l.b16 %v419_v8  ;;  %465 = vmatpush.bf16.msra.mxu1 %v453_v9 }
 0x55a   :  { %v333_v16 = vpop.f32.mrf.mxu1 }
 0x55b   :  { %v451_v14 = vpack.c.b16 %v450_v12, %v449_v10  ;;  %v334_v20 = vadd.f32 %v333_v16, %v1009_v55 }
 0x55d   :  { %695 = vmatmul.msk.bf16.vlgmr.msra.gmra.mxu1 %vm180_vm8, %v451_v14 }
 0x562   :  { %v335_v17 = vpop.f32.mrf.mxu1 }
 0x563   :  { %v336_v25 = vadd.f32 %v335_v17, %v1011_v56  ;;  %v728_v56 = vld [vmem:[%s1083_s3 + $0x8] sm:$0xff] }
 0x564   :  { %542 = vmatpush.bf16.msra.mxu0 %v728_v56 }
 0x568   :  { %543 = vmatpush.bf16.msra.mxu0 %v727_v32 }
 0x5ca   :  { %v440_v18 = vpop.f32.mrf.mxu0 }
 0x5cb   :  { %v445_v21 = vadd.f32 %v440_v18, %v334_v20 }
 0x5d2   :  { %v442_v24 = vpop.f32.mrf.mxu0 }
 0x5d3   :  { %v446_v27 = vadd.f32 %v442_v24, %v336_v25 }
 0x5da   :  { %v467_v22 = vpop.f32.mrf.mxu1 }
 0x5db   :  { %v472_v15 = vadd.f32 %v467_v22, %v445_v21 }
 0x5dd   :  { %v1033_v23 = vadd.f32 %v472_v15, %v926_v0 }
 0x5df   :  { %v476_v26 = vmul.f32 %v1033_v23, %v1033_v23 }
 0x5e1   :  { %v478_v28 = vsel %vm57_vm0, %v476_v26, 0.0 }
 0x5e2   :  { %v469_v19 = vpop.f32.mrf.mxu1  ;;  %479 = vadd.xlane.f32.xlu1 %v478_v28 }
 0x5e3   :  { %v473_v29 = vadd.f32 %v469_v19, %v446_v27 }
 0x5e5   :  { %v1040_v55 = vadd.f32 %v473_v29, %v933_v2 }
 0x5e7   :  { %v477_v30 = vmul.f32 %v1040_v55, %v1040_v55 }
 0x5e9   :  { %v481_v0 = vsel %vm57_vm0, %v477_v30, 0.0 }
 0x5ea   :  { %482 = vadd.xlane.f32.xlu1 %v481_v0 }
 0x655   :  { %v480_v31 = vpop.xlane.xlu1 %479 }
 0x656   :  { %v484_v33 = vmul.f32 %v480_v31, %v942_v13 }
 0x658   :  { %v486_v2 = vadd.f32 1e-06, %v484_v33 }
 0x65a   :  { %786 = vrsqrt.f32 %v486_v2  ;;  %vm494_vm11 = vweird.f32 %v486_v2 }
 0x65d   :  { %v483_v34 = vpop.xlane.xlu1 %482 }
 0x65e   :  { %v485_v35 = vmul.f32 %v483_v34, %v942_v13  ;;  %v747_v13 = vld [vmem:[%s1086_s6] ss:$0 sm:$0xff] }
 0x660   :  { %v787_v36 = vpop.eup %786  ;;  %v487_v37 = vadd.f32 1e-06, %v485_v35 }
 0x661   :  { %v489_v38 = vmul.f32 %v787_v36, %v486_v2  ;;  %vm495_vm10 = vweird.f32 %v787_v36 }
 0x662   :  { %788 = vrsqrt.f32 %v487_v37  ;;  %vm496_vm12 = vmor %vm494_vm11, %vm495_vm10  ;;  %vm504_vm14 = vweird.f32 %v487_v37 }
 0x663   :  { %v490_v39 = vmul.f32 %v787_v36, %v489_v38 }
 0x665   :  { %v491_v40 = vmul.f32 0.5, %v490_v39 }
 0x667   :  { %v492_v41 = vsub.f32 1.5, %v491_v40 }
 0x668   :  { %v789_v42 = vpop.eup %788 }
 0x669   :  { %v499_v43 = vmul.f32 %v789_v42, %v487_v37  ;;  %v493_v44 = vmul.f32 %v787_v36, %v492_v41  ;;  %vm505_vm13 = vweird.f32 %v789_v42 }
 0x66a   :  { %vm506_vm15 = vmor %vm504_vm14, %vm505_vm13 }
 0x66b   :  { %v500_v45 = vmul.f32 %v789_v42, %v499_v43  ;;  %v497_v47 = vsel %vm496_vm12, %v787_v36, %v493_v44 }
 0x66c   :  { %v508_v50 = vmul.f32 %v497_v47, %v1033_v23 }
 0x66d   :  { %v501_v46 = vmul.f32 0.5, %v500_v45 }
 0x66e   :  { %v514_v53 = vmul.f32 %v747_v13, %v508_v50 }
 0x66f   :  { %v502_v48 = vsub.f32 1.5, %v501_v46 }
 0x671   :  { %v503_v49 = vmul.f32 %v789_v42, %v502_v48 }
 0x673   :  { %v507_v51 = vsel %vm506_vm15, %v789_v42, %v503_v49 }
 0x674   :  { %v509_v52 = vmul.f32 %v507_v51, %v1040_v55 }
 0x676   :  { %v515_v54 = vmul.f32 %v747_v13, %v509_v52 }
 0x678   :  { %v516_v57 = vpack.c.bf16 %v515_v54, %v514_v53 }
 0x67a   :  { %704 = vmatmul.msk.bf16.vlgmr.msra.gmra.mxu0 %vm57_vm0, %v516_v57 }
 0x6f7   :  { %v545_v58 = vpop.f32.mrf.mxu0 }
 0x6f8   :  { %592 = vrot.lane.b32.xlu1 %v545_v58, %s851_s18  ;;  %v705_v61 = vmul.f32 -1.442695, %v545_v58 }
 0x6fa   :  { %790 = vpow2.f32 %v705_v61 }
 0x6ff   :  { %v547_v60 = vpop.f32.mrf.mxu0 }
 0x700   :  { %594 = vrot.lane.b32.xlu0 %v547_v60, %s851_s18  ;;  %v706_v62 = vmul.f32 -1.442695, %v547_v60  ;;  %v791_v63 = vpop.eup %790 }
 0x701   :  { %v556_v4 = vadd.f32 1.0, %v791_v63 }
 0x702   :  { %792 = vpow2.f32 %v706_v62 }
 0x703   :  { %794 = vrcp.f32 %v556_v4  ;;  %vm563_vm3 = vweird.f32 %v556_v4  ;;  %v569_v22 = vand.u32 2147483648, %v556_v4  ;;  %v567_v24 = vand.u32 2147483647, %v556_v4 }
 0x705   :  { %v570_v28 = vor.u32 1.1754944e-38, %v569_v22  ;;  %vm568_vm8 = vcmp.eq.f32.partialorder %v567_v24, 8.507059e+37 }
 0x708   :  { %v793_v3 = vpop.eup %792 }
 0x709   :  { %v557_v5 = vadd.f32 1.0, %v793_v3  ;;  %v795_v7 = vpop.eup %794 }
 0x70a   :  { %v559_v10 = vmul.f32 %v795_v7, %v556_v4  ;;  %vm564_vm1 = vweird.f32 %v795_v7 }
 0x70b   :  { %796 = vrcp.f32 %v557_v5  ;;  %v584_v21 = vand.u32 2147483648, %v557_v5  ;;  %vm578_vm4 = vweird.f32 %v557_v5  ;;  %v582_v15 = vand.u32 2147483647, %v557_v5  ;;  %vm565_vm5 = vmor %vm563_vm3, %vm564_vm1 }
 0x70c   :  { %v560_v14 = vsub.f32 1.0, %v559_v10 }
 0x70d   :  { %v585_v27 = vor.u32 1.1754944e-38, %v584_v21  ;;  %vm583_vm7 = vcmp.eq.f32.partialorder %v582_v15, 8.507059e+37 }
 0x70e   :  { %v561_v17 = vmul.f32 %v795_v7, %v560_v14 }
 0x710   :  { %v562_v20 = vadd.f32 %v795_v7, %v561_v17 }
 0x711   :  { %v797_v8 = vpop.eup %796 }
 0x712   :  { %v574_v9 = vmul.f32 %v797_v8, %v557_v5  ;;  %vm579_vm2 = vweird.f32 %v797_v8  ;;  %v566_v26 = vsel %vm565_vm5, %v795_v7, %v562_v20 }
 0x713   :  { %vm580_vm6 = vmor %vm578_vm4, %vm579_vm2  ;;  %v571_v29 = vsel %vm568_vm8, %v570_v28, %v566_v26 }
 0x714   :  { %v575_v12 = vsub.f32 1.0, %v574_v9  ;;  %v588_v56 = vmul.f32 %v571_v29, %v545_v58 }
 0x716   :  { %v576_v16 = vmul.f32 %v797_v8, %v575_v12 }
 0x718   :  { %v577_v18 = vadd.f32 %v797_v8, %v576_v16 }
 0x71a   :  { %v581_v25 = vsel %vm580_vm6, %v797_v8, %v577_v18 }
 0x71b   :  { %v586_v19 = vsel %vm583_vm7, %v585_v27, %v581_v25 }
 0x71c   :  { %v589_v0 = vmul.f32 %v586_v19, %v547_v60 }
 0x76a   :  { %v593_v30 = vpop.permute.xlu1 %592 }
 0x76b   :  { %v598_v32 = vmul.f32 %v593_v30, %v588_v56 }
 0x772   :  { %v595_v31 = vpop.permute.xlu0 %594 }
 0x773   :  { %v599_v33 = vmul.f32 %v595_v31, %v589_v0 }
 0x775   :  { %v600_v2 = vpack.c.bf16 %v599_v33, %v598_v32 }
 0x777   :  { %723 = vmatmul.msk.bf16.vlgmr.msrb.gmra.mxu2 %vm633_vm9, %v600_v2 }
 0x7fa   :  { %v646_v34 = vpop.f32.mrf.mxu2 }
 0x7fb   :  { %v651_v35 = vadd.f32 %v646_v34, %v1033_v23 }
 0x7fd   :  { %653 = vst.msk [vmem:[#allocation5] sm:$0xff] %vm57_vm0, %v651_v35 }
 0x802   :  { %v648_v36 = vpop.f32.mrf.mxu2 }
 0x803   :  { %v652_v37 = vadd.f32 %v648_v36, %v1040_v55 }
 0x805   :  { %654 = vst.msk [vmem:[#allocation5 + $0x8] sm:$0xff] %vm57_vm0, %v652_v37 }
 0x806   :  { %667 = dma.vmem_to_hbm [thread:$0]  %s660_s12, 256, %s662_s15, [#allocation4], %s861_s7, %s861_s7, %s862_s16  }
 0x807   :  { %848 = dma.done.wait [#allocation4], 256  }
 0x808   :  { %849 = vsyncadd [#allocation4], 4294967040 }
 0x809   :  { %672 = vsyncpa [#allocation3], 1 }
 0x80a   :  { %673 = vsyncpa [#allocation4], 1 }

</bundles_post_ra>
